<compile_context>
chip_gen: v7x
topology: tpu7x:2x2x1
jax: 0.10.0
libtpu: 0.0.40
codegen_flags: <defaults>
</compile_context>

<pallas_src>
import functools

import jax
import jax.numpy as jnp
from jax import lax
from jax.experimental import pallas as pl
from jax.experimental.pallas import tpu as pltpu


def _round_up(v: int, m: int) -> int:
    return ((v + m - 1) // m) * m


def _sym_quant_codes(t, bits, code_dtype):
    """Per-tensor symmetric quant -> (integer-valued codes in code_dtype, scale)."""
    qmax = jnp.float32(2.0 ** (bits - 1) - 1.0)
    scale = jnp.maximum(
        jnp.max(jnp.abs(t)).astype(jnp.float32) / qmax, jnp.float32(1e-12))
    codes = jnp.clip(jnp.round(t.astype(jnp.float32) * (1.0 / scale)), -qmax, qmax)
    return codes.astype(code_dtype), scale


def _fq_linear_kernel(scale_ref, x_ref, w_ref, b_ref, o_ref):
    """One (tb, tn) output tile; accumulates over the K grid axis into o_ref.

    scale_ref: (1,) f32 in SMEM  -- x_scale * w_scale (dequant folded into epilogue)
    x_ref:     (tb, tk)          -- pre-quantized activation codes
    w_ref:     (tk, tn)          -- pre-quantized, pre-transposed weight codes
    b_ref:     (1, tn) f32       -- bias tile
    o_ref:     (tb, tn) f32      -- output tile (doubles as the accumulator)
    """
    k = pl.program_id(2)

    @pl.when(k == 0)
    def _():
        o_ref[...] = jnp.zeros_like(o_ref)

    # Pure MXU work: integer-valued bf16 codes, f32 accumulation.
    o_ref[...] += jnp.dot(x_ref[...], w_ref[...],
                          preferred_element_type=jnp.float32)

    @pl.when(k == pl.num_programs(2) - 1)
    def _():
        o_ref[...] = o_ref[...] * scale_ref[0] + b_ref[...]


def prepare_quantized_weight(weight, weight_bits=8, *, chunk_size=-1,
                             block_n=512, block_k=1024):
    """One-time weight prep: fake-quant codes, transpose to (K, N), pad to tiles."""
    assert weight.ndim == 2, "weight must be (out_features, in_features)"
    assert chunk_size in (-1, 1), "only per-tensor quantization supported"
    N, K = weight.shape

    tn = min(block_n, _round_up(N, 128))
    tk = min(block_k, _round_up(K, 128))
    N_pad = _round_up(N, tn)
    K_pad = _round_up(K, tk)

    # Codes with |q| <= 255 are exactly representable in bf16.
    code_dtype = jnp.bfloat16 if weight_bits <= 9 else jnp.float32
    wq, w_scale = _sym_quant_codes(weight, weight_bits, code_dtype)
    wq_t = wq.T  # (K, N): canonical RHS layout, lane-dense along N.
    if (K_pad, N_pad) != (K, N):
        wq_t = jnp.pad(wq_t, ((0, K_pad - K), (0, N_pad - N)))

    return dict(wq_t=wq_t, w_scale=w_scale, out_features=N, in_features=K,
                tn=tn, tk=tk, weight_bits=weight_bits)


def fake_quant_weights_linear_prepared(x, prepared, bias=None, *,
                                       activation_bits=8, block_b=None):
    """y = fake_quant(x) @ fake_quant(W).T + bias, with W pre-quantized."""
    assert x.ndim == 2, "layout: x is (batch, in_features)"
    B, K = x.shape
    N = prepared["out_features"]
    assert K == prepared["in_features"], "in_features mismatch"
    tn, tk = prepared["tn"], prepared["tk"]

    wq_t = prepared["wq_t"]
    K_pad, N_pad = wq_t.shape

    # Matmul code dtype: bf16 when all codes fit exactly, else f32 fallback.
    if activation_bits <= 9 and wq_t.dtype == jnp.bfloat16:
        mm_dtype = jnp.bfloat16
    else:
        mm_dtype = jnp.float32
        if wq_t.dtype != jnp.float32:
            wq_t = wq_t.astype(jnp.float32)

    tb = block_b if block_b is not None else min(
        256 if B >= 256 else 128, _round_up(B, 8))
    B_pad = _round_up(B, tb)

    # Pre-quantize activations once (single pass, halves x DMA vs f32).
    xq, x_scale = _sym_quant_codes(x, activation_bits, mm_dtype)
    if (B_pad, K_pad) != (B, K):
        xq = jnp.pad(xq, ((0, B_pad - B), (0, K_pad - K)))

    out_scale = (x_scale * prepared["w_scale"]).reshape(1,).astype(jnp.float32)

    if bias is None:
        bias2d = jnp.zeros((1, N_pad), jnp.float32)
    else:
        bias2d = bias.astype(jnp.float32).reshape(1, N)
        if N_pad != N:
            bias2d = jnp.pad(bias2d, ((0, 0), (0, N_pad - N)))

    grid = (B_pad // tb, N_pad // tn, K_pad // tk)

    out = pl.pallas_call(
        _fq_linear_kernel,
        out_shape=jax.ShapeDtypeStruct((B_pad, N_pad), jnp.float32),
        grid_spec=pltpu.PrefetchScalarGridSpec(
            num_scalar_prefetch=0,
            grid=grid,
            in_specs=[
                # Single dequant scale via the scalar path (SMEM), not VMEM.
                pl.BlockSpec(memory_space=pltpu.MemorySpace.SMEM),
                pl.BlockSpec((tb, tk), lambda i, j, k: (i, k)),   # xq codes
                pl.BlockSpec((tk, tn), lambda i, j, k: (k, j)),   # wq codes (K, N)
                pl.BlockSpec((1, tn), lambda i, j, k: (0, j)),    # bias
            ],
            out_specs=pl.BlockSpec((tb, tn), lambda i, j, k: (i, j)),
        ),
        compiler_params=pltpu.CompilerParams(
            dimension_semantics=("parallel", "parallel", "arbitrary"),
            vmem_limit_bytes=32 * 1024 * 1024,
        ),
    )(out_scale, xq, wq_t, bias2d)

    if (B_pad, N_pad) != (B, N):
        out = out[:B, :N]
    return out


def fake_quant_weights_linear(x, weight, bias=None, *, activation_bits=8,
                              weight_bits=8, chunk_size=-1,
                              block_b=None, block_n=512, block_k=1024):
    """Convenience one-shot path (prep + call). Prefer preparing weights once."""
    prepared = prepare_quantized_weight(weight, weight_bits, chunk_size=chunk_size,
                                        block_n=block_n, block_k=block_k)
    return fake_quant_weights_linear_prepared(
        x, prepared, bias, activation_bits=activation_bits, block_b=block_b)


def _reference(x, weight, bias, activation_bits=8, weight_bits=8):
    """Pure-JAX reference of the assumed forward semantics."""
    def fq(t, bits):
        qmax = 2.0 ** (bits - 1) - 1.0
        scale = jnp.maximum(jnp.max(jnp.abs(t)) / qmax, 1e-12)
        return jnp.clip(jnp.round(t / scale), -qmax, qmax) * scale

    xq = fq(x, activation_bits)
    wq = fq(weight, weight_bits)
    y = jnp.dot(xq, wq.T, precision=lax.Precision.HIGHEST)
    return y + bias[None, :]


if __name__ == "__main__":
    key = jax.random.PRNGKey(0)
    k_x, k_w, k_b = jax.random.split(key, 3)

    batch = 16
    in_features = 256
    out_features = 384

    x = jax.random.normal(k_x, (batch, in_features), dtype=jnp.float32)
    weight = jax.random.normal(k_w, (out_features, in_features), dtype=jnp.float32) * 0.05
    bias = jax.random.normal(k_b, (out_features,), dtype=jnp.float32) * 0.1

    # Small tiles here purely to exercise a multi-tile (1, 3, 2) grid at this
    # small problem size; production defaults are block_n=512, block_k=1024.
    prepared = prepare_quantized_weight(weight, weight_bits=8, chunk_size=-1,
                                        block_n=128, block_k=128)
    out = fake_quant_weights_linear_prepared(x, prepared, bias, activation_bits=8)
    out = jax.block_until_ready(out)

    ref = _reference(x, weight, bias)
    assert out.shape == (batch, out_features)
    assert jnp.allclose(out, ref, atol=1e-4, rtol=1e-4), "mismatch vs reference"

    print("KERNEL_OK")
</pallas_src>

<mosaic_0001>
module attributes {stable_mosaic.version = 11 : i64} {
  func.func @_fq_linear_kernel(%arg0: i32, %arg1: i32, %arg2: i32, %arg3: memref<1xf32, #tpu.memory_space<smem>>, %arg4: memref<16x128xbf16, #tpu.memory_space<vmem>>, %arg5: memref<128x128xbf16, #tpu.memory_space<vmem>>, %arg6: memref<1x128xf32, #tpu.memory_space<vmem>>, %arg7: memref<16x128xf32, #tpu.memory_space<vmem>>) attributes {dimension_semantics = [#tpu.dimension_semantics<parallel>, #tpu.dimension_semantics<parallel>, #tpu.dimension_semantics<arbitrary>], iteration_bounds = array<i64: 1, 3, 2>, scalar_prefetch = 0 : i64, scratch_operands = 0 : i64, tpu.core_type = #tpu.core_type<tc>, window_params = [{transform_indices = @transform_0, window_bounds = array<i64: 1>}, {transform_indices = @transform_1, window_bounds = array<i64: 16, 128>}, {transform_indices = @transform_2, window_bounds = array<i64: 128, 128>}, {transform_indices = @transform_3, window_bounds = array<i64: 1, 128>}, {transform_indices = @transform_4, window_bounds = array<i64: 16, 128>}]} {
    %c0_i32 = arith.constant 0 : i32
    %0 = arith.cmpi eq, %arg2, %c0_i32 : i32
    %1 = arith.extui %0 : i1 to i32
    %c0_i32_0 = arith.constant 0 : i32
    %2 = arith.cmpi ne, %1, %c0_i32_0 : i32
    scf.if %2 {
      %cst_9 = arith.constant 0.000000e+00 : f32
      %12 = vector.broadcast %cst_9 : f32 to vector<16x128xf32>
      %c0_10 = arith.constant 0 : index
      %c0_11 = arith.constant 0 : index
      %13 = vector.load %arg7[%c0_10, %c0_11] : memref<16x128xf32, #tpu.memory_space<vmem>>, vector<16x128xf32>
      tpu.vector_store %arg7[%c0_10, %c0_11], %12 {strides = array<i32>} : memref<16x128xf32, #tpu.memory_space<vmem>>, vector<16x128xf32>,
    } else {
    }
    %c0 = arith.constant 0 : index
    %c0_1 = arith.constant 0 : index
    %3 = vector.load %arg7[%c0, %c0_1] : memref<16x128xf32, #tpu.memory_space<vmem>>, vector<16x128xf32>
    %c0_2 = arith.constant 0 : index
    %c0_3 = arith.constant 0 : index
    %4 = vector.load %arg4[%c0_2, %c0_3] : memref<16x128xbf16, #tpu.memory_space<vmem>>, vector<16x128xbf16>
    %c0_4 = arith.constant 0 : index
    %c0_5 = arith.constant 0 : index
    %5 = vector.load %arg5[%c0_4, %c0_5] : memref<128x128xbf16, #tpu.memory_space<vmem>>, vector<128x128xbf16>
    %cst = arith.constant dense<0.000000e+00> : vector<16x128xf32>
    %6 = tpu.matmul %4, %5, %cst {dimension_numbers = #tpu.dot_dimension_numbers<[1], [0], [0], [1], [0, 0, 1, 1], [], []>} : vector<16x128xbf16>, vector<128x128xbf16>, vector<16x128xf32> -> vector<16x128xf32>
    %7 = arith.addf %3, %6 : vector<16x128xf32>
    %c0_6 = arith.constant 0 : index
    %c0_7 = arith.constant 0 : index
    %8 = vector.load %arg7[%c0_6, %c0_7] : memref<16x128xf32, #tpu.memory_space<vmem>>, vector<16x128xf32>
    tpu.vector_store %arg7[%c0_6, %c0_7], %7 {strides = array<i32>} : memref<16x128xf32, #tpu.memory_space<vmem>>, vector<16x128xf32>,
    %c1_i32 = arith.constant 1 : i32
    %9 = arith.cmpi eq, %arg2, %c1_i32 : i32
    %10 = arith.extui %9 : i1 to i32
    %c0_i32_8 = arith.constant 0 : i32
    %11 = arith.cmpi ne, %10, %c0_i32_8 : i32
    scf.if %11 {
      %c0_9 = arith.constant 0 : index
      %c0_10 = arith.constant 0 : index
      %12 = vector.load %arg7[%c0_9, %c0_10] : memref<16x128xf32, #tpu.memory_space<vmem>>, vector<16x128xf32>
      %c0_11 = arith.constant 0 : index
      %13 = memref.load %arg3[%c0_11] : memref<1xf32, #tpu.memory_space<smem>>
      %14 = vector.broadcast %13 : f32 to vector<16x128xf32>
      %15 = arith.mulf %12, %14 : vector<16x128xf32>
      %c0_12 = arith.constant 0 : index
      %c0_13 = arith.constant 0 : index
      %16 = vector.load %arg6[%c0_12, %c0_13] : memref<1x128xf32, #tpu.memory_space<vmem>>, vector<1x128xf32>
      %17 = vector.broadcast %16 : vector<1x128xf32> to vector<16x128xf32>
      %18 = arith.addf %15, %17 : vector<16x128xf32>
      %c0_14 = arith.constant 0 : index
      %c0_15 = arith.constant 0 : index
      %19 = vector.load %arg7[%c0_14, %c0_15] : memref<16x128xf32, #tpu.memory_space<vmem>>, vector<16x128xf32>
      tpu.vector_store %arg7[%c0_14, %c0_15], %18 {strides = array<i32>} : memref<16x128xf32, #tpu.memory_space<vmem>>, vector<16x128xf32>,
    } else {
    }
    return
  }
  func.func @transform_0(%arg0: i32, %arg1: i32, %arg2: i32) -> i32 {
    %c0_i32 = arith.constant 0 : i32
    %c0_i32_0 = arith.constant 0 : i32
    return %c0_i32 : i32
  }
  func.func @transform_1(%arg0: i32, %arg1: i32, %arg2: i32) -> (i32, i32) {
    %c0_i32 = arith.constant 0 : i32
    return %arg0, %arg2 : i32, i32
  }
  func.func @transform_2(%arg0: i32, %arg1: i32, %arg2: i32) -> (i32, i32) {
    %c0_i32 = arith.constant 0 : i32
    return %arg2, %arg1 : i32, i32
  }
  func.func @transform_3(%arg0: i32, %arg1: i32, %arg2: i32) -> (i32, i32) {
    %c0_i32 = arith.constant 0 : i32
    %c0_i32_0 = arith.constant 0 : i32
    return %c0_i32, %arg1 : i32, i32
  }
  func.func @transform_4(%arg0: i32, %arg1: i32, %arg2: i32) -> (i32, i32) {
    %c0_i32 = arith.constant 0 : i32
    return %arg0, %arg1 : i32, i32
  }
}

</mosaic_0001>

<bundles_post_ra>
// kernel: tpu_custom_call.1
= control target key start
LH: loop header
LB: loop body
LE: loop exit
PB: predicated region body
PF: predicated region fallthrough
CT: control target
= control target key end

     0   :  { %s1459_s0 = inlined_call_operand.<no memory space> [shape: f32[1], index: 0, kind: input, shape index: {}]   ;;  %s1460_s1 = inlined_call_operand.hbm [shape: bf16[16,256], index: 1, kind: input, shape index: {}]   ;;  %s1461_s2 = inlined_call_operand.hbm [shape: bf16[256,384], index: 2, kind: input, shape index: {}]   ;;  %s1462_s3 = inlined_call_operand.vmem [shape: f32[1,384], index: 3, kind: input, shape index: {}]   ;;  %s1463_s4 = inlined_call_operand.hbm [shape: f32[16,384], index: 4, kind: output, shape index: {}]  }
   0x1   :  { %1476 = sst [smem:[#allocation17_spill]] %s1460_s1 }
   0x2   :  { %1477 = sst [smem:[#allocation18_spill]] %s1463_s4 }
   0x3   :  { %9 = sst [smem:[#allocation2]] %s1459_s0 }
   0x4   :  { %10 = vsyncpa [#allocation4], 0 }
   0x5   :  { %12 = vsyncpa [#allocation4 + $0x1], 0 }
   0x6   :  { %13 = vsyncpa [#allocation7], 0 }
   0x7   :  { %15 = vsyncpa [#allocation7 + $0x1], 0 }
   0x8   :  { %16 = vsyncpa [#allocation5], 0 }
   0x9   :  { %18 = vsyncpa [#allocation5 + $0x1], 0  ;;  %s1054_s17 = smov 0   ;;  %s1056_s18 = smov 0  }
   0xa   :  { %s1058_s19 = smov 0   ;;  %s1060_s20 = smov 0  }
   0xb   :  { %s1062_s21 = smov 0   ;;  %s1064_s22 = smov 0  }
   0xc   :  { %s1066_s23 = smov 0   ;;  %s1068_s0 = smov 0  }
   0xd   :  { %s1070_s24 = smov 0   ;;  %s1072_s25 = smov 0  }
   0xe   :  { %s1074_s26 = smov 0   ;;  %s1076_s27 = smov 0  }
   0xf   :  { %s1078_s28 = smov 0   ;;  %s1080_s29 = smov 0  }
  0x10 LB: > { %1478 = sst [smem:[#allocation12_spill]] %s991_s24  ;;  %s591_s30 = sadd.s32 4294967295, %s1011_s29   ;;  %s1011_s29 = sphi %s1080_s29, %s24_s29   ;;  %s1007_s28 = sphi %s1078_s28, %s1525_s28   ;;  %s1003_s27 = sphi %s1076_s27, %s1524_s27   ;;  %s999_s26 = sphi %s1074_s26, %s1523_s26   ;;  %s995_s25 = sphi %s1072_s25, %s1522_s25   ;;  %s991_s24 = sphi %s1070_s24, %s1511_s24   ;;  %s987_s0 = sphi %s1068_s0, %s1521_s0   ;;  %s983_s23 = sphi %s1066_s23, %s1520_s23   ;;  %s979_s22 = sphi %s1064_s22, %s1519_s22   ;;  %s975_s21 = sphi %s1062_s21, %s1518_s21   ;;  %s971_s20 = sphi %s1060_s20, %s1517_s20   ;;  %s967_s19 = sphi %s1058_s19, %s1516_s19   ;;  %s963_s18 = sphi %s1056_s18, %s1515_s18   ;;  %s959_s17 = sphi %s1054_s17, %s1514_s17  }
  0x11   : > { %1479 = sst [smem:[#allocation13_spill]] %s995_s25  ;;  %s36_s5 = sadd.s32 1, %s1003_s27 }
  0x12   : > { %p1124_p0 = scmp.ge.s32.totalorder %s36_s5, 2  ;;  %s73_s7 = sadd.s32 1, %s991_s24 }
  0x13   : > { %p80_p1 = scmp.ne.s32.totalorder %s991_s24, %s987_s0  ;;  %p1467_p2 = scmp.eq.s32.totalorder %s1011_s29, 0 }
  0x14   : > { %s1527_s5 = smov (%p1124_p0, %s36_s5), 0  ;;  %p86_p4 = scmp.ne.s32.totalorder %s987_s0, %s983_s23 }
  0x15   : > { %1481 = sst [smem:[#allocation14_spill]] %s1527_s5  ;;  %p1138_p3 = por %p1467_p2, %p80_p1 }
  0x16   : > { %s1145_s9 = ssub.s32 %s1003_s27, %s1527_s5  ;;  %p1147_p5 = scmp.eq.s32.totalorder %s591_s30, 0 }
  0x17   : > { %p71_p6 = scmp.eq.s32.totalorder %s1145_s9, 0  ;;  %p1152_p7 = scmp.eq.s32.totalorder %s591_s30, 5 }
  0x18   : > { %s1483_s10 = scalar_select %p1147_p5, 1, 0 }
  0x19   : > { %s1484_s11 = scalar_select %p1152_p7, 1, 0 }
  0x1a   : > { %p1158_p8 = por %p1147_p5, %p86_p4  ;;  %p1466_p9 = scmp.lt.s32.totalorder %s1011_s29, 6 }
  0x1b   : > { %s1163_s13 = scalar_select %p71_p6, %s991_s24, %s73_s7  }
  0x1c   : > { %s1485_s12 = scalar_select %p1158_p8, 1, 0 }
  0x1d   : > { %1486 = sst [smem:[#allocation15_spill]] %s1163_s13  ;;  %s195_s14 = sand.u32 1, %s991_s24  }
  0x1e   : > { %s595_s15 = sshll.u32 %s195_s14, 3  ;;  %s596_s16 = sshll.u32 %s1003_s27, 6 }
  0x1f   : > { %s1487_s1 = sld [smem:[#allocation17_spill]]  ;;  %s199_s30 = scalar_lea.vmem [#allocation3], %s595_s15 }
  0x20   : > { %s208_s25 = sshll.u32 %s199_s30, 4  ;;  %p1179_p10 = pnand %p1466_p9, %p1138_p3  ;;  %s1173_s25 = int_to_ptr.vmem [resolvable:$true] %s208_s25 }
  0x21   : > { %s1183_s13 = scalar_lea.sflag [#allocation4], %s195_s14 }
  0x22   : > { %p803_p12 = pneg %p1179_p10 }
  0x25   : > { %s1171_s4 = scalar_lea.hbm %s1487_s1, %s596_s16  ;;  %s806_s8 = scalar_lea.hbm %s1487_s1, 256 }
  0x26   : > { %s801_s5 = scalar_lea.hbm %s1171_s4, 128  ;;  %p807_p3 = scmp.lt.u32.totalorder %s1171_s4, %s1487_s1 }
  0x27   : > { %p802_p11 = scmp.ne.s32.totalorder %s1171_s4, %s801_s5  ;;  %p808_p4 = scmp.lt.u32.totalorder %s806_s8, %s801_s5 }
  0x28   : > { %p810_p9 = scmp.lt.u32.totalorder %s801_s5, %s1171_s4 }
  0x29   : > { %p804_p13 = pnand %p803_p12, %p802_p11  ;;  %p809_p6 = por %p808_p4, %p807_p3 }
  0x2b   : > { %p805_p1 = pneg %p804_p13  ;;  %p811_p2 = por %p810_p9, %p809_p6 }
  0x2d   : > { %p812_p8 = pnand %p811_p2, %p805_p1 }
  0x2f   : > { %815 = shalt.err (!%p812_p8)
}
  0x30   : > { %s816_s14 = scalar_lea.vmem %s1173_s25, 128  ;;  %s1013_s15 = smov [#allocation3]  }
  0x31   : > { %p817_p11 = scmp.ne.s32.totalorder %s1173_s25, %s816_s14  ;;  %s821_s16 = sshll.u32 %s1013_s15, 4  ;;  %s822_s16 = int_to_ptr.vmem [resolvable:$false] %s821_s16 }
  0x32   : > { %s823_s23 = scalar_lea.vmem %s822_s16, 256  ;;  %p824_p5 = scmp.lt.s32.totalorder %s1173_s25, %s822_s16 }
  0x33   : > { %p819_p13 = pnand %p817_p11, %p803_p12  ;;  %p825_p3 = scmp.lt.s32.totalorder %s823_s23, %s816_s14 }
  0x35   : > { %p820_p7 = pneg %p819_p13  ;;  %p826_p4 = por %p825_p3, %p824_p5 }
  0x37   : > { %p827_p9 = pnand %p826_p4, %p820_p7 }
  0x39   : > { %830 = shalt.err (!%p827_p9)
}
  0x3a   : > { %s1014_s5 = smov 128   ;;  %s1470_s8 = smov 64  }
  0x3b   : > { %s1471_s30 = smov 4   ;;  %p601_p2 = scmp.ge.s32.totalorder %s1011_s29, 1 }
  0x3c   : > { %660 = dma.hbm_to_vmem [thread:$0]  (!%p1179_p10), %s1171_s4, 128, %s1173_s25, %s1183_s13, %s1014_s5, %s1470_s8, %s1471_s30  }
  0x3d   : > { %p245_p5 = scmp.lt.s32.totalorder %s1011_s29, 7  ;;  %s592_s15 = sadd.s32 4294967294, %s1011_s29  }
  0x3e   : > { %s39_s16 = sadd.s32 1, %s1007_s28  ;;  %s101_s23 = sadd.s32 1, %s979_s22 }
  0x3f   : > { %p1215_p7 = pnand %p601_p2, %p245_p5  ;;  %s1529_s16 = smov (!%p1124_p0, %s39_s16), %s1007_s28 }
  0x40   : > { %p108_p8 = scmp.ne.s32.totalorder %s979_s22, %s975_s21  ;;  %p114_p10 = scmp.ne.s32.totalorder %s975_s21, %s971_s20 }
  0x41   : > { %p41_p12 = scmp.ge.s32.totalorder %s1529_s16, 3  ;;  %s155_s4 = sadd.s32 1, %s967_s19 }
  0x42   : > { %p1490_p1 = scmp.eq.s32.totalorder %s1011_s29, 0  ;;  %p1492_p11 = scmp.ne.s32.totalorder %s1483_s10, 0 }
  0x43   : > { %s1531_s16 = smov (%p41_p12, %s1529_s16), 0  ;;  %p165_p0 = scmp.ne.s32.totalorder %s967_s19, %s963_s18 }
  0x44   : > { %p1232_p6 = por %p108_p8, %p1490_p1  ;;  %p1238_p13 = por %p114_p10, %p1492_p11 }
  0x45   : > { %1494 = sst [smem:[#allocation16_spill]] %s1531_s16  ;;  %p171_p3 = scmp.ne.s32.totalorder %s963_s18, %s959_s17 }
  0x46   : > { %s1493_s13 = scalar_select %p1238_p13, 1, 0 }
  0x47   : > { %s97_s20 = ssub.s32 %s1007_s28, %s1531_s16  ;;  %p172_p4 = scmp.eq.s32.totalorder %s592_s15, 5 }
  0x48   : > { %s98_s6 = sor.u32 %s97_s20, %s1145_s9  ;;  %p153_p9 = scmp.eq.s32.totalorder %s97_s20, 0 }
  0x49   : > { %p99_p2 = scmp.eq.s32.totalorder %s98_s6, 0  ;;  %p1495_p5 = scmp.ne.s32.totalorder %s1484_s11, 0 }
  0x4a   : > { %s1258_s7 = scalar_select %p153_p9, %s967_s19, %s155_s4  }
  0x4b   : > { %p1253_p8 = por %p1495_p5, %p165_p0  ;;  %p1263_p10 = por %p172_p4, %p171_p3 }
  0x4c   : > { %s1261_s5 = scalar_select %p99_p2, %s979_s22, %s101_s23  }
  0x4d   : > { %s1496_s10 = scalar_select %p1253_p8, 1, 0 }
  0x4e   : > { %s1497_s8 = scalar_select %p1263_p10, 1, 0 }
  0x4f   : > { %s218_s30 = sand.u32 1, %s979_s22   ;;  %s650_s16 = smul.u32 48, %s1003_s27 }
  0x50   : > { %s597_s1 = sshll.u32 %s218_s30, 6  ;;  %p1498_p12 = scmp.lt.s32.totalorder %s1011_s29, 6 }
  0x51   : > { %s222_s15 = scalar_lea.vmem [#allocation6], %s597_s1  ;;  %s228_s4 = sadd.s32 %s1007_s28, %s650_s16 }
  0x52   : > { %s231_s9 = sshll.u32 %s222_s15, 4  ;;  %p1273_p1 = pnand %p1498_p12, %p1232_p6  ;;  %s1278_s9 = int_to_ptr.vmem [resolvable:$true] %s231_s9 }
  0x53   : > { %s600_s23 = sshll.u32 %s228_s4, 6  ;;  %s1285_s1 = scalar_lea.sflag [#allocation7], %s218_s30 }
  0x54   : > { %s1283_s24 = scalar_lea.hbm %s1461_s2, %s600_s23  ;;  %p833_p11 = pneg %p1273_p1 }
  0x55   : > { %s831_s25 = scalar_lea.hbm %s1283_s24, 1024  ;;  %s836_s4 = scalar_lea.hbm %s1461_s2, 6144 }
  0x56   : > { %p832_p6 = scmp.ne.s32.totalorder %s1283_s24, %s831_s25  ;;  %p837_p4 = scmp.lt.u32.totalorder %s1283_s24, %s1461_s2 }
  0x57   : > { %p838_p9 = scmp.lt.u32.totalorder %s836_s4, %s831_s25  ;;  %p840_p5 = scmp.lt.u32.totalorder %s831_s25, %s1283_s24 }
  0x58   : > { %p834_p0 = pnand %p833_p11, %p832_p6 }
  0x59   : > { %p839_p2 = por %p838_p9, %p837_p4 }
  0x5a   : > { %p835_p3 = pneg %p834_p0 }
  0x5b   : > { %p841_p12 = por %p840_p5, %p839_p2 }
  0x5d   : > { %p842_p10 = pnand %p841_p12, %p835_p3 }
  0x5f   : > { %845 = shalt.err (!%p842_p10)
}
  0x60   : > { %s846_s30 = scalar_lea.vmem %s1278_s9, 1024  ;;  %s1017_s6 = smov [#allocation6]  }
  0x61   : > { %p847_p6 = scmp.ne.s32.totalorder %s1278_s9, %s846_s30  ;;  %s851_s16 = sshll.u32 %s1017_s6, 4  ;;  %s852_s16 = int_to_ptr.vmem [resolvable:$false] %s851_s16 }
  0x62   : > { %s853_s15 = scalar_lea.vmem %s852_s16, 2048  ;;  %p854_p13 = scmp.lt.s32.totalorder %s1278_s9, %s852_s16 }
  0x63   : > { %p849_p0 = pnand %p847_p6, %p833_p11  ;;  %p855_p4 = scmp.lt.s32.totalorder %s853_s15, %s846_s30 }
  0x65   : > { %p850_p8 = pneg %p849_p0  ;;  %p856_p9 = por %p855_p4, %p854_p13 }
  0x67   : > { %p857_p2 = pnand %p856_p9, %p850_p8 }
  0x69   : > { %860 = shalt.err (!%p857_p2)
}
  0x6a   : > { %s1018_s25 = smov 192   ;;  %s1500_s4 = smov 4  }
  0x6b   : > { %s1501_s23 = smov 64   ;;  %249 = sbr.rel (%p1215_p7) target bundleno = 425 (0x1a9), region = 36 }
  0x6c   : > { %663 = dma.hbm_to_vmem [thread:$0]  (!%p1273_p1), %s1283_s24, 1024, %s1278_s9, %s1285_s1, %s1018_s25, %s1501_s23, %s1500_s4  }
  0x6d   : > { %s251_s20 = sand.u32 (!%p1215_p7), 1, %s987_s0   ;;  %p1502_p13 = scmp.ne.s32.totalorder (!%p1215_p7), %s1485_s12, 0 }
  0x6e   : > { %s1318_s6 = sshll.u32 (!%p1215_p7), %s251_s20, 3  ;;  %s252_s30 = scalar_lea.sflag (!%p1215_p7), [#allocation4], %s251_s20 }
  0x6f   : > { %s255_s16 = scalar_lea.vmem (!%p1215_p7), [#allocation3], %s1318_s6 }
  0x72   : > { %946 = dma.done.wait (%p1502_p13), %s252_s30, 128  }
  0x73   : > { %948 = vsyncadd (%p1502_p13), %s252_s30, 4294967168  ;;  %s260_s11 = sand.u32 1, %s975_s21   ;;  %p1503_p7 = scmp.ne.s32.totalorder %s1493_s13, 0 }
  0x74   : > { %s603_s24 = sshll.u32 %s260_s11, 6  ;;  %s261_s9 = scalar_lea.sflag [#allocation7], %s260_s11 }
  0x75   : > { %s1326_s14 = scalar_lea.vmem [#allocation6], %s603_s24 }
  0x76   : > { %950 = dma.done.wait (%p1503_p7), %s261_s9, 1024  }
  0x77   : > { %952 = vsyncadd (%p1503_p7), %s261_s9, 4294966272  ;;  %s294_s1 = sand.u32 1, %s963_s18   ;;  %p299_p8 = scmp.lt.s32.totalorder %s999_s26, 2 }
  0x78   : > { %s604_s12 = sshll.u32 %s294_s1, 4  ;;  %s1504_s30 = sld [smem:[#allocation13_spill]] }
  0x79   : > { %s1337_s15 = scalar_select %p299_p8, %s999_s26, 2 }
  0x7a   : > { %s1343_s20 = scalar_lea.vmem [#allocation8], %s604_s12 }
  0x7b   : > { %s301_s23 = scalar_lea.vmem %s1462_s3, %s1337_s15 }
  0x7e   : > { %p605_p10 = scmp.ne.s32.totalorder %s1504_s30, 0 }
  0x7f   : > { %v1019_v0 = vmov (!%p605_p10), 0.0  }
  0x80   : > { %307 = sbr.rel (%p605_p10) target bundleno = 135 (0x87), region = 48  ;;  %308 = vst [vmem:[%s1343_s20] sm:$0xff] (!%p605_p10), %v1019_v0  ;;  %309 = vst [vmem:[%s1343_s20 + $0x8] sm:$0xff] (!%p605_p10), %v1019_v0 }
  0x87 PF: > { %v792_v1 = vld [vmem:[%s1326_s14] sm:$0xff]   ;;  %v1020_v2 = vmov 0.0   ;;  %v793_v3 = vld [vmem:[%s1326_s14 + $0x8] sm:$0xff]   ;;  %vm1021_vm0 = vmmov 0   ;;  %v794_v4 = vld [vmem:[%s1326_s14 + $0x10] sm:$0xff]   ;;  %s1505_s13 = sld [smem:[#allocation13_spill]] }
  0x88   : > { %630 = vmatprep.subr.bf16.mxu0 %v1020_v2  ;;  %646 = vmatprep.mubr.msk.bf16.mxu0 %vm1021_vm0, %v1020_v2  ;;  %v795_v5 = vld [vmem:[%s1326_s14 + $0x18] sm:$0xff]   ;;  %v796_v6 = vld [vmem:[%s1326_s14 + $0x20] sm:$0xff]   ;;  %v797_v7 = vld [vmem:[%s1326_s14 + $0x28] sm:$0xff]  }
  0x89   : > { %631 = vmatpush3.bf16.msra.mxu0 %v792_v1  ;;  %v798_v8 = vld [vmem:[%s1326_s14 + $0x30] sm:$0xff]   ;;  %v799_v9 = vld [vmem:[%s1326_s14 + $0x38] sm:$0xff]  }
  0x8a   : > { %632 = vmatprep.subr.bf16.mxu0 %v1020_v2  ;;  %v800_v10 = vld [vmem:[%s255_s16] sm:$0xff]   ;;  %v310_v11 = vld [vmem:[%s1343_s20] sm:$0xff] }
  0x8b   : > { %v311_v13 = vld [vmem:[%s1343_s20 + $0x8] sm:$0xff] }
  0x8d   : > { %633 = vmatpush3.bf16.msra.mxu0 %v793_v3  ;;  %p615_p1 = scmp.ne.s32.totalorder %s1505_s13, 1 }
  0x8e   : > { %634 = vmatprep.subr.bf16.mxu0 %v1020_v2  ;;  %s435_s11 = sld [smem:[#allocation2]] (!%p615_p1)  ;;  %v616_v22 = vld [vmem:[%s301_s23] ss:$0 sm:$0xff] (!%p615_p1) }
  0x91   : > { %635 = vmatpush3.bf16.msra.mxu0 %v794_v4 }
  0x92   : > { %636 = vmatprep.subr.bf16.mxu0 %v1020_v2 }
  0x94   : > { %v436_v21 = vstv (!%p615_p1), %s435_s11 }
  0x95   : > { %637 = vmatpush3.bf16.msra.mxu0 %v795_v5 }
  0x96   : > { %638 = vmatprep.subr.bf16.mxu0 %v1020_v2 }
  0x99   : > { %639 = vmatpush3.bf16.msra.mxu0 %v796_v6 }
  0x9a   : > { %640 = vmatprep.subr.bf16.mxu0 %v1020_v2 }
  0x9d   : > { %641 = vmatpush3.bf16.msra.mxu0 %v797_v7 }
  0x9e   : > { %642 = vmatprep.subr.bf16.mxu0 %v1020_v2 }
  0xa1   : > { %643 = vmatpush3.bf16.msra.mxu0 %v798_v8 }
  0xa2   : > { %644 = vmatprep.subr.bf16.mxu0 %v1020_v2 }
  0xa5   : > { %645 = vmatpush3.bf16.msra.mxu0 %v799_v9 }
  0xa8   : > { %647 = vmatmul.mubr.bf16.vlgmr.msra.gmra.mrb[0].mxu0 %v800_v10 }
 0x17a   : > { %432 = sbr.rel (%p615_p1) target bundleno = 397 (0x18d), region = 52 }
 0x17b   : > { %v418_v12 = vpop.f32.mrb[0].mxu0 }
 0x17c   : > { %v425_v14 = vadd.f32 %v418_v12, %v310_v11  ;;  %v648_v15 = vpop.f32.mrb[1].mxu0 }
 0x17d   : > { %v421_v16 = vpop.f32.mrb[2].mxu0 }
 0x17e   : > { %427 = vst [vmem:[%s1343_s20] sm:$0xff] %v425_v14  ;;  %v426_v17 = vadd.f32 %v421_v16, %v311_v13  ;;  %v649_v18 = vpop.f32.mrb[3].mxu0 }
 0x180   : > { %428 = vst [vmem:[%s1343_s20 + $0x8] sm:$0xff] %v426_v17 }
 0x185   : > { %v433_v19 = vld [vmem:[%s1343_s20] sm:$0xff] }
 0x186   : > { %v437_v23 = vmul.f32 %v436_v21, %v433_v19 }
 0x187   : > { %v434_v20 = vld [vmem:[%s1343_s20 + $0x8] sm:$0xff] }
 0x188   : > { %v438_v24 = vmul.f32 %v436_v21, %v434_v20  ;;  %v446_v25 = vadd.f32 %v616_v22, %v437_v23 }
 0x18a   : > { %v447_v26 = vadd.f32 %v616_v22, %v438_v24  ;;  %448 = vst [vmem:[%s1343_s20] sm:$0xff] %v446_v25 }
 0x18c   : > { %449 = vst [vmem:[%s1343_s20 + $0x8] sm:$0xff] %v447_v26 }
 0x18d PF: > { %s618_s24 = sshll.u32 %s999_s26, 7  ;;  %s1506_s12 = sld [smem:[#allocation18_spill]] }
 0x18e   : > { %s466_s4 = sshll.u32 %s1343_s20, 4  ;;  %s1383_s15 = scalar_lea.sflag [#allocation5], %s294_s1  ;;  %s1379_s4 = int_to_ptr.vmem [resolvable:$true] %s466_s4 }
 0x18f   : > { %s861_s23 = scalar_lea.vmem %s1379_s4, 256  ;;  %p1507_p3 = scmp.ne.s32.totalorder %s1496_s10, 0 }
 0x190   : > { %p862_p11 = scmp.ne.s32.totalorder %s1379_s4, %s861_s23  ;;  %s1022_s26 = smov [#allocation8]  }
 0x191   : > { %s865_s30 = sshll.u32 %s1022_s26, 4  ;;  %s866_s30 = int_to_ptr.vmem [resolvable:$false] %s865_s30 }
 0x192   : > { %p863_p5 = pnand %p862_p11, %p1507_p3  ;;  %s867_s13 = scalar_lea.vmem %s866_s30, 512 }
 0x193   : > { %s1376_s25 = scalar_lea.hbm %s1506_s12, %s618_s24  ;;  %p868_p6 = scmp.lt.s32.totalorder %s1379_s4, %s866_s30 }
 0x194   : > { %p864_p12 = pneg %p863_p5  ;;  %p869_p0 = scmp.lt.s32.totalorder %s867_s13, %s861_s23 }
 0x196   : > { %p870_p4 = por %p869_p0, %p868_p6 }
 0x198   : > { %p871_p9 = pnand %p870_p4, %p864_p12 }
 0x19a   : > { %874 = shalt.err (!%p871_p9)
}
 0x19b   : > { %s875_s1 = scalar_lea.hbm %s1376_s25, 256  ;;  %s879_s6 = scalar_lea.hbm %s1506_s12, 768 }
 0x19c   : > { %p876_p2 = scmp.ne.s32.totalorder %s1376_s25, %s875_s1  ;;  %p880_p8 = scmp.lt.u32.totalorder %s1376_s25, %s1506_s12 }
 0x19d   : > { %p881_p10 = scmp.lt.u32.totalorder %s879_s6, %s875_s1  ;;  %p883_p11 = scmp.lt.u32.totalorder %s875_s1, %s1376_s25 }
 0x19e   : > { %p877_p13 = pnand %p876_p2, %p1507_p3 }
 0x19f   : > { %p882_p1 = por %p881_p10, %p880_p8 }
 0x1a0   : > { %p878_p7 = pneg %p877_p13 }
 0x1a1   : > { %p884_p5 = por %p883_p11, %p882_p1 }
 0x1a3   : > { %p885_p12 = pnand %p884_p5, %p878_p7 }
 0x1a5   : > { %888 = shalt.err (!%p885_p12)
}
 0x1a6   : > { %s1023_s9 = smov 128   ;;  %s1024_s14 = smov 384  }
 0x1a7   : > { %s1025_s23 = smov 8  }
 0x1a8   : > { %655 = dma.vmem_to_hbm [thread:$0]  (%p1507_p3), %s1379_s4, 256, %s1376_s25, %s1383_s15, %s1023_s9, %s1024_s14, %s1025_s23  }
 0x1a9 PF: > { %p669_p6 = scmp.ge.s32.totalorder %s1011_s29, 2  ;;  %s481_s26 = sand.u32 1, %s959_s17  }
 0x1aa   : > { %p1508_p0 = scmp.ne.s32.totalorder %s1497_s8, 0  ;;  %s482_s30 = scalar_lea.sflag [#allocation5], %s481_s26 }
 0x1ac   : > { %p665_p4 = pnand %p669_p6, %p1508_p0 }
 0x1ae   : > { %954 = dma.done.wait (!%p665_p4), %s482_s30, 256  }
 0x1af   : > { %956 = vsyncadd (!%p665_p4), %s482_s30, 4294967040  ;;  %s24_s29 = sadd.s32 1, %s1011_s29   ;;  %s1510_s10 = sld [smem:[#allocation12_spill]] }
 0x1b0   : > { %p1412_p9 = scmp.ge.s32.totalorder %s24_s29, 8   ;;  %s1511_s24 = sld [smem:[#allocation15_spill]] }
 0x1b1   : > { %s1512_s8 = sld [smem:[#allocation14_spill]]  ;;  %s1513_s4 = sld [smem:[#allocation16_spill]] }
 0x1b2   : > { %s1514_s17 = smov %s963_s18  ;;  %s1515_s18 = smov %s967_s19 }
 0x1b3   : > { %s1516_s19 = smov %s1258_s7  ;;  %s1517_s20 = smov %s975_s21 }
 0x1b4   : > { %s1518_s21 = smov %s979_s22  ;;  %s1519_s22 = smov %s1261_s5 }
 0x1b5   : > { %s1520_s23 = smov %s987_s0  ;;  %s1521_s0 = smov %s1510_s10 }
 0x1b6   : > { %s1522_s25 = smov %s1003_s27  ;;  %s1523_s26 = smov %s1007_s28 }
 0x1b7   : > { %s1524_s27 = smov %s1512_s8  ;;  %s1525_s28 = smov %s1513_s4 }
 0x1b8   :  { %23 = sbr.rel (!%p1412_p9) target bundleno = 16 (0x10), region = 105 }
 0x1bf   :  { %487 = vsyncpa [#allocation4], 1 }
 0x1c0   :  { %489 = vsyncpa [#allocation4 + $0x1], 1 }
 0x1c1   :  { %490 = vsyncpa [#allocation7], 1 }
 0x1c2   :  { %492 = vsyncpa [#allocation7 + $0x1], 1 }
 0x1c3   :  { %493 = vsyncpa [#allocation5], 1 }
 0x1c4   :  { %495 = vsyncpa [#allocation5 + $0x1], 1 }

</bundles_post_ra>
